<compile_context>
chip_gen: v7x
topology: tpu7x:2x2x1
jax: 0.10.0
libtpu: 0.0.40
codegen_flags: <defaults>
</compile_context>

<pallas_src>
import jax
import jax.numpy as jnp
from jax.experimental import pallas as pl
from jax.experimental.pallas import tpu as pltpu


def film_kernel(x_ref, w_ref, b_ref, gate_ref, out_ref):
    """One (tm x tn) tile of the fused [gammas | betas] output."""
    y = jnp.dot(x_ref[...], w_ref[...], preferred_element_type=jnp.float32)
    y = (y + b_ref[...]) * gate_ref[...]           # bias + pre-tanh'd gate row
    out_ref[...] = y.astype(out_ref.dtype)


def _round_up(v, m):
    return (v + m - 1) // m * m


def film_forward(x, wg, bg, wb, bb, gamma_gate, beta_gate, *,
                 tm=512, tn=512, compute_dtype=None,
                 vmem_limit_bytes=48 * 1024 * 1024):
    """FiLM.forward.  x: (B, S, D_in) -> [x, gammas, betas] with (B, S, D_out)."""
    B, S, D_in = x.shape
    D_out = wg.shape[1]
    M = B * S
    N = 2 * D_out                                   # fused gammas|betas columns
    compute_dtype = jnp.dtype(compute_dtype) if compute_dtype is not None else x.dtype

    # Row tile: large by default, clipped for small problems; rows padded to tm.
    row_align = 8 if jnp.dtype(compute_dtype).itemsize >= 4 else 16
    tm = max(row_align, min(tm, _round_up(M, row_align)))
    M_pad = _round_up(M, tm)
    # Output-column tile: multiple of 128 lanes so stores are unmasked (lane-dense).
    tn = max(128, min(_round_up(tn, 128), _round_up(N, 128)))
    N_pad = _round_up(N, tn)

    # Flatten tokens; fuse weights/biases/gates; pad to tile boundaries.
    x2d = x.reshape(M, D_in)
    if M_pad != M:
        x2d = jnp.pad(x2d, ((0, M_pad - M), (0, 0)))
    x2d = x2d.astype(compute_dtype)

    w = jnp.concatenate([wg, wb], axis=1)                       # (D_in, 2*D_out)
    b = jnp.concatenate([bg.reshape(-1), bb.reshape(-1)])       # (2*D_out,)
    g_gate = jnp.tanh(gamma_gate.reshape(()).astype(jnp.float32))
    b_gate = jnp.tanh(beta_gate.reshape(()).astype(jnp.float32))
    gate = jnp.concatenate([jnp.full((D_out,), g_gate, jnp.float32),
                            jnp.full((D_out,), b_gate, jnp.float32)])
    if N_pad != N:
        w = jnp.pad(w, ((0, 0), (0, N_pad - N)))
        b = jnp.pad(b, (0, N_pad - N))
        gate = jnp.pad(gate, (0, N_pad - N))
    w = w.astype(compute_dtype)
    b_row = b.reshape(1, N_pad).astype(jnp.float32)
    gate_row = gate.reshape(1, N_pad).astype(jnp.float32)

    # n outer, m inner: the (D_in, tn) weight block stays resident across the
    # entire row sweep (same block index -> no re-DMA per step).
    grid = (N_pad // tn, M_pad // tm)

    def _call(single_buffer_weights):
        pm = dict(pipeline_mode=pl.Buffered(1)) if single_buffer_weights else {}
        in_specs = [
            pl.BlockSpec((tm, D_in), lambda n, m: (m, 0)),          # x rows (streamed)
            pl.BlockSpec((D_in, tn), lambda n, m: (0, n), **pm),    # fused [Wg|Wb]
            pl.BlockSpec((1, tn), lambda n, m: (0, n), **pm),       # fused bias row
            pl.BlockSpec((1, tn), lambda n, m: (0, n), **pm),       # tanh(gate) row
        ]
        return pl.pallas_call(
            film_kernel,
            out_shape=jax.ShapeDtypeStruct((M_pad, N_pad), x.dtype),
            grid_spec=pltpu.PrefetchScalarGridSpec(
                num_scalar_prefetch=0,
                grid=grid,
                in_specs=in_specs,
                out_specs=pl.BlockSpec((tm, tn), lambda n, m: (m, n)),
            ),
            compiler_params=pltpu.CompilerParams(
                dimension_semantics=("parallel", "parallel"),
                vmem_limit_bytes=vmem_limit_bytes,
            ),
        )(x2d, w, b_row, gate_row)

    try:
        fused = _call(single_buffer_weights=True)
    except Exception:
        # Graceful fallback for jax versions without pl.Buffered(1) support on
        # pallas_call BlockSpecs (default double-buffering; same numerics).
        fused = _call(single_buffer_weights=False)

    fused = fused[:M, :N]
    gammas = fused[:, :D_out].reshape(B, S, D_out)
    betas = fused[:, D_out:].reshape(B, S, D_out)
    return [x, gammas, betas]


def init_film_params(key, input_dim, output_dim):
    """Deterministic synthetic init matching the PyTorch __init__ shapes.

    nn.Linear(input_dim, output_dim): weight (output_dim, input_dim), bias (output_dim,)
    (stored here pre-transposed as (input_dim, output_dim) for x @ W).
    gammas_gate / betas_gate: (1, 1, 1).  PyTorch inits gates to zero; we use
    small nonzero values so the kernel output is non-trivial to check.
    """
    ks = jax.random.split(key, 6)
    wg = jax.random.normal(ks[0], (input_dim, output_dim), jnp.float32) * 0.02
    bg = jax.random.normal(ks[1], (output_dim,), jnp.float32) * 0.02
    wb = jax.random.normal(ks[2], (input_dim, output_dim), jnp.float32) * 0.02
    bb = jax.random.normal(ks[3], (output_dim,), jnp.float32) * 0.02
    gamma_gate = jax.random.normal(ks[4], (1, 1, 1), jnp.float32) * 0.5
    beta_gate = jax.random.normal(ks[5], (1, 1, 1), jnp.float32) * 0.5
    return wg, bg, wb, bb, gamma_gate, beta_gate


if __name__ == "__main__":
    B, S, D_IN, D_OUT = 2, 8, 32, 64

    key = jax.random.PRNGKey(0)
    kx, kp = jax.random.split(key)
    x = jax.random.normal(kx, (B, S, D_IN), jnp.float32)
    wg, bg, wb, bb, gamma_gate, beta_gate = init_film_params(kp, D_IN, D_OUT)

    # Pure-JAX reference.
    ref_g = (x @ wg + bg) * jnp.tanh(gamma_gate)
    ref_b = (x @ wb + bb) * jnp.tanh(beta_gate)

    # f32 compute path.
    out = jax.block_until_ready(
        film_forward(x, wg, bg, wb, bb, gamma_gate, beta_gate))
    x_out, gammas, betas = out
    assert x_out.shape == (B, S, D_IN)
    assert gammas.shape == (B, S, D_OUT) and betas.shape == (B, S, D_OUT)
    assert jnp.allclose(gammas, ref_g, atol=1e-4, rtol=1e-4)
    assert jnp.allclose(betas, ref_b, atol=1e-4, rtol=1e-4)
    assert jnp.allclose(x_out, x)

    # bf16 compute path (bandwidth-bound production config); f32 accumulation.
    _, g16, b16 = jax.block_until_ready(
        film_forward(x, wg, bg, wb, bb, gamma_gate, beta_gate,
                     compute_dtype=jnp.bfloat16))
    assert jnp.allclose(g16, ref_g, atol=3e-2, rtol=3e-2)
    assert jnp.allclose(b16, ref_b, atol=3e-2, rtol=3e-2)

    print("KERNEL_OK")
</pallas_src>

<mosaic_0001>
module attributes {stable_mosaic.version = 11 : i64} {
  func.func @film_kernel(%arg0: i32, %arg1: i32, %arg2: memref<16x32xf32, #tpu.memory_space<vmem>>, %arg3: memref<32x128xf32, #tpu.memory_space<vmem>>, %arg4: memref<1x128xf32, #tpu.memory_space<vmem>>, %arg5: memref<1x128xf32, #tpu.memory_space<vmem>>, %arg6: memref<16x128xf32, #tpu.memory_space<vmem>>) attributes {dimension_semantics = [#tpu.dimension_semantics<parallel>, #tpu.dimension_semantics<parallel>], iteration_bounds = array<i64: 1, 1>, scalar_prefetch = 0 : i64, scratch_operands = 0 : i64, tpu.core_type = #tpu.core_type<tc>, window_params = [{transform_indices = @transform_0, window_bounds = array<i64: 16, 32>}, {pipeline_mode = #tpu.pipeline_mode<synchronous>, transform_indices = @transform_1, window_bounds = array<i64: 32, 128>}, {pipeline_mode = #tpu.pipeline_mode<synchronous>, transform_indices = @transform_2, window_bounds = array<i64: 1, 128>}, {pipeline_mode = #tpu.pipeline_mode<synchronous>, transform_indices = @transform_3, window_bounds = array<i64: 1, 128>}, {transform_indices = @transform_4, window_bounds = array<i64: 16, 128>}]} {
    %c0 = arith.constant 0 : index
    %c0_0 = arith.constant 0 : index
    %0 = vector.load %arg2[%c0, %c0_0] : memref<16x32xf32, #tpu.memory_space<vmem>>, vector<16x32xf32>
    %c0_1 = arith.constant 0 : index
    %c0_2 = arith.constant 0 : index
    %1 = vector.load %arg3[%c0_1, %c0_2] : memref<32x128xf32, #tpu.memory_space<vmem>>, vector<32x128xf32>
    %cst = arith.constant dense<0.000000e+00> : vector<16x128xf32>
    %2 = tpu.matmul %0, %1, %cst {dimension_numbers = #tpu.dot_dimension_numbers<[1], [0], [0], [1], [0, 0, 1, 1], [], []>} : vector<16x32xf32>, vector<32x128xf32>, vector<16x128xf32> -> vector<16x128xf32>
    %c0_3 = arith.constant 0 : index
    %c0_4 = arith.constant 0 : index
    %3 = vector.load %arg4[%c0_3, %c0_4] : memref<1x128xf32, #tpu.memory_space<vmem>>, vector<1x128xf32>
    %4 = vector.broadcast %3 : vector<1x128xf32> to vector<16x128xf32>
    %5 = arith.addf %2, %4 : vector<16x128xf32>
    %c0_5 = arith.constant 0 : index
    %c0_6 = arith.constant 0 : index
    %6 = vector.load %arg5[%c0_5, %c0_6] : memref<1x128xf32, #tpu.memory_space<vmem>>, vector<1x128xf32>
    %7 = vector.broadcast %6 : vector<1x128xf32> to vector<16x128xf32>
    %8 = arith.mulf %5, %7 : vector<16x128xf32>
    %c0_7 = arith.constant 0 : index
    %c0_8 = arith.constant 0 : index
    %9 = vector.load %arg6[%c0_7, %c0_8] : memref<16x128xf32, #tpu.memory_space<vmem>>, vector<16x128xf32>
    tpu.vector_store %arg6[%c0_7, %c0_8], %8 {strides = array<i32>} : memref<16x128xf32, #tpu.memory_space<vmem>>, vector<16x128xf32>,
    return
  }
  func.func @transform_0(%arg0: i32, %arg1: i32) -> (i32, i32) {
    %c0_i32 = arith.constant 0 : i32
    %c0_i32_0 = arith.constant 0 : i32
    return %arg1, %c0_i32 : i32, i32
  }
  func.func @transform_1(%arg0: i32, %arg1: i32) -> (i32, i32) {
    %c0_i32 = arith.constant 0 : i32
    %c0_i32_0 = arith.constant 0 : i32
    return %c0_i32, %arg0 : i32, i32
  }
  func.func @transform_2(%arg0: i32, %arg1: i32) -> (i32, i32) {
    %c0_i32 = arith.constant 0 : i32
    %c0_i32_0 = arith.constant 0 : i32
    return %c0_i32, %arg0 : i32, i32
  }
  func.func @transform_3(%arg0: i32, %arg1: i32) -> (i32, i32) {
    %c0_i32 = arith.constant 0 : i32
    %c0_i32_0 = arith.constant 0 : i32
    return %c0_i32, %arg0 : i32, i32
  }
  func.func @transform_4(%arg0: i32, %arg1: i32) -> (i32, i32) {
    %c0_i32 = arith.constant 0 : i32
    return %arg1, %arg0 : i32, i32
  }
}

module attributes {stable_mosaic.version = 11 : i64} {
  func.func @film_kernel(%arg0: i32, %arg1: i32, %arg2: memref<16x32xf32, #tpu.memory_space<vmem>>, %arg3: memref<32x128xf32, #tpu.memory_space<vmem>>, %arg4: memref<1x128xf32, #tpu.memory_space<vmem>>, %arg5: memref<1x128xf32, #tpu.memory_space<vmem>>, %arg6: memref<16x128xf32, #tpu.memory_space<vmem>>) attributes {dimension_semantics = [#tpu.dimension_semantics<parallel>, #tpu.dimension_semantics<parallel>], iteration_bounds = array<i64: 1, 1>, scalar_prefetch = 0 : i64, scratch_operands = 0 : i64, tpu.core_type = #tpu.core_type<tc>, window_params = [{transform_indices = @transform_0, window_bounds = array<i64: 16, 32>}, {transform_indices = @transform_1, window_bounds = array<i64: 32, 128>}, {transform_indices = @transform_2, window_bounds = array<i64: 1, 128>}, {transform_indices = @transform_3, window_bounds = array<i64: 1, 128>}, {transform_indices = @transform_4, window_bounds = array<i64: 16, 128>}]} {
    %c0 = arith.constant 0 : index
    %c0_0 = arith.constant 0 : index
    %0 = vector.load %arg2[%c0, %c0_0] : memref<16x32xf32, #tpu.memory_space<vmem>>, vector<16x32xf32>
    %c0_1 = arith.constant 0 : index
    %c0_2 = arith.constant 0 : index
    %1 = vector.load %arg3[%c0_1, %c0_2] : memref<32x128xf32, #tpu.memory_space<vmem>>, vector<32x128xf32>
    %cst = arith.constant dense<0.000000e+00> : vector<16x128xf32>
    %2 = tpu.matmul %0, %1, %cst {dimension_numbers = #tpu.dot_dimension_numbers<[1], [0], [0], [1], [0, 0, 1, 1], [], []>} : vector<16x32xf32>, vector<32x128xf32>, vector<16x128xf32> -> vector<16x128xf32>
    %c0_3 = arith.constant 0 : index
    %c0_4 = arith.constant 0 : index
    %3 = vector.load %arg4[%c0_3, %c0_4] : memref<1x128xf32, #tpu.memory_space<vmem>>, vector<1x128xf32>
    %4 = vector.broadcast %3 : vector<1x128xf32> to vector<16x128xf32>
    %5 = arith.addf %2, %4 : vector<16x128xf32>
    %c0_5 = arith.constant 0 : index
    %c0_6 = arith.constant 0 : index
    %6 = vector.load %arg5[%c0_5, %c0_6] : memref<1x128xf32, #tpu.memory_space<vmem>>, vector<1x128xf32>
    %7 = vector.broadcast %6 : vector<1x128xf32> to vector<16x128xf32>
    %8 = arith.mulf %5, %7 : vector<16x128xf32>
    %c0_7 = arith.constant 0 : index
    %c0_8 = arith.constant 0 : index
    %9 = vector.load %arg6[%c0_7, %c0_8] : memref<16x128xf32, #tpu.memory_space<vmem>>, vector<16x128xf32>
    tpu.vector_store %arg6[%c0_7, %c0_8], %8 {strides = array<i32>} : memref<16x128xf32, #tpu.memory_space<vmem>>, vector<16x128xf32>,
    return
  }
  func.func @transform_0(%arg0: i32, %arg1: i32) -> (i32, i32) {
    %c0_i32 = arith.constant 0 : i32
    %c0_i32_0 = arith.constant 0 : i32
    return %arg1, %c0_i32 : i32, i32
  }
  func.func @transform_1(%arg0: i32, %arg1: i32) -> (i32, i32) {
    %c0_i32 = arith.constant 0 : i32
    %c0_i32_0 = arith.constant 0 : i32
    return %c0_i32, %arg0 : i32, i32
  }
  func.func @transform_2(%arg0: i32, %arg1: i32) -> (i32, i32) {
    %c0_i32 = arith.constant 0 : i32
    %c0_i32_0 = arith.constant 0 : i32
    return %c0_i32, %arg0 : i32, i32
  }
  func.func @transform_3(%arg0: i32, %arg1: i32) -> (i32, i32) {
    %c0_i32 = arith.constant 0 : i32
    %c0_i32_0 = arith.constant 0 : i32
    return %c0_i32, %arg0 : i32, i32
  }
  func.func @transform_4(%arg0: i32, %arg1: i32) -> (i32, i32) {
    %c0_i32 = arith.constant 0 : i32
    return %arg1, %arg0 : i32, i32
  }
}

</mosaic_0001>

<bundles_post_ra>
// kernel: tpu_custom_call.1
= control target key start
LH: loop header
LB: loop body
LE: loop exit
PB: predicated region body
PF: predicated region fallthrough
CT: control target
= control target key end

     0   :  { %9 = vsyncpa [#allocation3], 0  ;;  %s357_s0 = inlined_call_operand.hbm [shape: f32[16,32], index: 0, kind: input, shape index: {}]   ;;  %s358_s1 = inlined_call_operand.hbm [shape: f32[32,128], index: 1, kind: input, shape index: {}]   ;;  %s359_s2 = inlined_call_operand.vmem [shape: f32[1,128], index: 2, kind: input, shape index: {}]   ;;  %s360_s3 = inlined_call_operand.vmem [shape: f32[1,128], index: 3, kind: input, shape index: {}]   ;;  %s361_s4 = inlined_call_operand.hbm [shape: f32[16,128], index: 4, kind: output, shape index: {}]  }
   0x1   :  { %10 = vsyncpa [#allocation6], 0 }
   0x2   :  { %11 = vsyncpa [#allocation4], 0  ;;  %s276_s15 = smov [#allocation2]   ;;  %s204_s19 = scalar_lea.hbm %s357_s0, 256 }
   0x3   :  { %s17_s16 = sshll.u32 %s276_s15, 4  ;;  %p205_p0 = scmp.ne.s32.totalorder %s357_s0, %s204_s19  ;;  %s18_s16 = int_to_ptr.vmem [resolvable:$true] %s17_s16 }
   0x4   :  { %p208_p1 = scmp.lt.u32.totalorder %s204_s19, %s357_s0 }
   0x6   :  { %p210_p2 = pnand %p208_p1, %p205_p0 }
   0x8   :  { %213 = shalt.err (!%p210_p2)
}
   0x9   :  { %s214_s24 = scalar_lea.vmem %s18_s16, 256  ;;  %p219_p4 = scmp.lt.s32.totalorder %s18_s16, %s18_s16 }
   0xa   :  { %p215_p3 = scmp.ne.s32.totalorder %s18_s16, %s214_s24  ;;  %p220_p5 = scmp.lt.s32.totalorder %s214_s24, %s214_s24 }
   0xc   :  { %p221_p6 = por %p220_p5, %p219_p4 }
   0xe   :  { %p222_p7 = pnand %p221_p6, %p215_p3 }
  0x10   :  { %225 = shalt.err (!%p222_p7)
}
  0x11   :  { %s277_s25 = smov 128   ;;  %s278_s26 = smov 8  }
  0x12   :  { %23 = dma.hbm_to_vmem [thread:$0]  %s357_s0, 256, %s18_s16, [#allocation3], %s277_s25, %s277_s25, %s278_s26  }
  0x13   :  { %s279_s29 = smov [#allocation5]   ;;  %s226_s7 = scalar_lea.hbm %s358_s1, 512 }
  0x14   :  { %s29_s30 = sshll.u32 %s279_s29, 4  ;;  %p227_p8 = scmp.ne.s32.totalorder %s358_s1, %s226_s7  ;;  %s30_s30 = int_to_ptr.vmem [resolvable:$true] %s29_s30 }
  0x15   :  { %p230_p9 = scmp.lt.u32.totalorder %s226_s7, %s358_s1 }
  0x17   :  { %p232_p10 = pnand %p230_p9, %p227_p8 }
  0x19   :  { %235 = shalt.err (!%p232_p10)
}
  0x1a   :  { %s236_s12 = scalar_lea.vmem %s30_s30, 512  ;;  %p241_p12 = scmp.lt.s32.totalorder %s30_s30, %s30_s30 }
  0x1b   :  { %p237_p11 = scmp.ne.s32.totalorder %s30_s30, %s236_s12  ;;  %p242_p13 = scmp.lt.s32.totalorder %s236_s12, %s236_s12 }
  0x1d   :  { %p243_p0 = por %p242_p13, %p241_p12 }
  0x1f   :  { %p244_p1 = pnand %p243_p0, %p237_p11 }
  0x21   :  { %247 = shalt.err (!%p244_p1)
}
  0x22   :  { %35 = dma.hbm_to_vmem [thread:$0]  %s358_s1, 512, %s30_s30, [#allocation6], %s277_s25, %s277_s25, %s278_s26  }
  0x23   :  { %270 = dma.done.wait [#allocation3], 256  }
  0x24   :  { %271 = vsyncadd [#allocation3], 4294967040 }
  0x25   :  { %272 = dma.done.wait [#allocation6], 512  }
  0x26   :  { %273 = vsyncadd [#allocation6], 4294966784  ;;  %vm59_vm0 = vcmask 261120   ;;  %v48_v0 = vld [vmem:[#allocation5] sm:$0xff]  ;;  %v49_v1 = vld [vmem:[#allocation5 + $0x8] sm:$0xff]  ;;  %s280_s17 = smov [#allocation7]  }
  0x27   :  { %v50_v2 = vld [vmem:[#allocation5 + $0x10] sm:$0xff]  ;;  %v191_v3 = vpack.c.bf16 %v49_v1, %v48_v0  ;;  %v51_v4 = vld [vmem:[#allocation5 + $0x18] sm:$0xff]  ;;  %s157_s18 = sshll.u32 %s280_s17, 4  ;;  %s158_s18 = int_to_ptr.vmem [resolvable:$true] %s157_s18 }
  0x28   :  { %v46_v5 = vld [vmem:[#allocation2] sm:$0xff]  ;;  %v195_v6 = vpack.c.bf16 %v51_v4, %v50_v2  ;;  %v47_v7 = vld [vmem:[#allocation2 + $0x8] sm:$0xff]  ;;  %s248_s19 = scalar_lea.vmem %s158_s18, 256  ;;  %p253_p3 = scmp.lt.s32.totalorder %s158_s18, %s158_s18 }
  0x29   :  { %188 = vmatprep.mubr.msk.f32.mxu0 %vm59_vm0, %v46_v5  ;;  %192 = vmatprep.subr.bf16.mxu0 %v191_v3  ;;  %v170_v8 = vld [vmem:[%s359_s2] ss:$0 sm:$0xff]  ;;  %p249_p2 = scmp.ne.s32.totalorder %s158_s18, %s248_s19  ;;  %p254_p4 = scmp.lt.s32.totalorder %s248_s19, %s248_s19 }
  0x2a   :  { %194 = vmatpush3.bf16.msra.mxu0 %v191_v3  ;;  %v173_v10 = vld [vmem:[%s360_s3] ss:$0 sm:$0xff] }
  0x2b   :  { %196 = vmatprep.subr.bf16.mxu0 %v195_v6  ;;  %p255_p5 = por %p254_p4, %p253_p3 }
  0x2d   :  { %p256_p6 = pnand %p255_p5, %p249_p2 }
  0x2e   :  { %198 = vmatpush3.bf16.msra.mxu0 %v195_v6 }
  0x31   :  { %189 = vmatmul.mubr.msk.f32.vlgmr.msra.gmra.mrb[0].mxu0 %vm59_vm0, %v47_v7 }
 0x104   :  { %v190_v9 = vpop.f32.mrb[0].mxu0 }
 0x105   :  { %v138_v11 = vadd.f32 %v190_v9, %v170_v8  ;;  %v132_v12 = vpop.f32.mrb[1].mxu0 }
 0x106   :  { %v133_v13 = vadd.f32 %v170_v8, %v132_v12 }
 0x107   :  { %v149_v14 = vmul.f32 %v173_v10, %v138_v11 }
 0x108   :  { %v148_v15 = vmul.f32 %v173_v10, %v133_v13 }
 0x109   :  { %151 = vst [vmem:[#allocation7 + $0x8] sm:$0xff] %v149_v14 }
 0x10a   :  { %150 = vst [vmem:[#allocation7] sm:$0xff] %v148_v15 }
 0x10b   :  { %259 = shalt.err (!%p256_p6)
}
 0x10c   :  { %s260_s3 = scalar_lea.hbm %s361_s4, 256 }
 0x10d   :  { %p261_p7 = scmp.ne.s32.totalorder %s361_s4, %s260_s3  ;;  %p264_p8 = scmp.lt.u32.totalorder %s260_s3, %s361_s4 }
 0x10f   :  { %p266_p9 = pnand %p264_p8, %p261_p7 }
 0x111   :  { %269 = shalt.err (!%p266_p9)
}
 0x112   :  { %163 = dma.vmem_to_hbm [thread:$0]  %s158_s18, 256, %s361_s4, [#allocation4], %s277_s25, %s277_s25, %s278_s26  }
 0x113   :  { %274 = dma.done.wait [#allocation4], 256  }
 0x114   :  { %275 = vsyncadd [#allocation4], 4294967040 }
 0x115   :  { %167 = vsyncpa [#allocation3], 1 }
 0x116   :  { %168 = vsyncpa [#allocation6], 1 }
 0x117   :  { %169 = vsyncpa [#allocation4], 1 }

// kernel: tpu_custom_call.1
= control target key start
LH: loop header
LB: loop body
LE: loop exit
PB: predicated region body
PF: predicated region fallthrough
CT: control target
= control target key end

     0   :  { %9 = vsyncpa [#allocation3], 0  ;;  %s357_s0 = inlined_call_operand.hbm [shape: f32[16,32], index: 0, kind: input, shape index: {}]   ;;  %s358_s1 = inlined_call_operand.hbm [shape: f32[32,128], index: 1, kind: input, shape index: {}]   ;;  %s359_s2 = inlined_call_operand.vmem [shape: f32[1,128], index: 2, kind: input, shape index: {}]   ;;  %s360_s3 = inlined_call_operand.vmem [shape: f32[1,128], index: 3, kind: input, shape index: {}]   ;;  %s361_s4 = inlined_call_operand.hbm [shape: f32[16,128], index: 4, kind: output, shape index: {}]  }
   0x1   :  { %10 = vsyncpa [#allocation6], 0 }
   0x2   :  { %11 = vsyncpa [#allocation4], 0  ;;  %s276_s15 = smov [#allocation2]   ;;  %s204_s19 = scalar_lea.hbm %s357_s0, 256 }
   0x3   :  { %s17_s16 = sshll.u32 %s276_s15, 4  ;;  %p205_p0 = scmp.ne.s32.totalorder %s357_s0, %s204_s19  ;;  %s18_s16 = int_to_ptr.vmem [resolvable:$true] %s17_s16 }
   0x4   :  { %p208_p1 = scmp.lt.u32.totalorder %s204_s19, %s357_s0 }
   0x6   :  { %p210_p2 = pnand %p208_p1, %p205_p0 }
   0x8   :  { %213 = shalt.err (!%p210_p2)
}
   0x9   :  { %s214_s24 = scalar_lea.vmem %s18_s16, 256  ;;  %p219_p4 = scmp.lt.s32.totalorder %s18_s16, %s18_s16 }
   0xa   :  { %p215_p3 = scmp.ne.s32.totalorder %s18_s16, %s214_s24  ;;  %p220_p5 = scmp.lt.s32.totalorder %s214_s24, %s214_s24 }
   0xc   :  { %p221_p6 = por %p220_p5, %p219_p4 }
   0xe   :  { %p222_p7 = pnand %p221_p6, %p215_p3 }
  0x10   :  { %225 = shalt.err (!%p222_p7)
}
  0x11   :  { %s277_s25 = smov 128   ;;  %s278_s26 = smov 8  }
  0x12   :  { %23 = dma.hbm_to_vmem [thread:$0]  %s357_s0, 256, %s18_s16, [#allocation3], %s277_s25, %s277_s25, %s278_s26  }
  0x13   :  { %s279_s29 = smov [#allocation5]   ;;  %s226_s7 = scalar_lea.hbm %s358_s1, 512 }
  0x14   :  { %s29_s30 = sshll.u32 %s279_s29, 4  ;;  %p227_p8 = scmp.ne.s32.totalorder %s358_s1, %s226_s7  ;;  %s30_s30 = int_to_ptr.vmem [resolvable:$true] %s29_s30 }
  0x15   :  { %p230_p9 = scmp.lt.u32.totalorder %s226_s7, %s358_s1 }
  0x17   :  { %p232_p10 = pnand %p230_p9, %p227_p8 }
  0x19   :  { %235 = shalt.err (!%p232_p10)
}
  0x1a   :  { %s236_s12 = scalar_lea.vmem %s30_s30, 512  ;;  %p241_p12 = scmp.lt.s32.totalorder %s30_s30, %s30_s30 }
  0x1b   :  { %p237_p11 = scmp.ne.s32.totalorder %s30_s30, %s236_s12  ;;  %p242_p13 = scmp.lt.s32.totalorder %s236_s12, %s236_s12 }
  0x1d   :  { %p243_p0 = por %p242_p13, %p241_p12 }
  0x1f   :  { %p244_p1 = pnand %p243_p0, %p237_p11 }
  0x21   :  { %247 = shalt.err (!%p244_p1)
}
  0x22   :  { %35 = dma.hbm_to_vmem [thread:$0]  %s358_s1, 512, %s30_s30, [#allocation6], %s277_s25, %s277_s25, %s278_s26  }
  0x23   :  { %270 = dma.done.wait [#allocation3], 256  }
  0x24   :  { %271 = vsyncadd [#allocation3], 4294967040 }
  0x25   :  { %272 = dma.done.wait [#allocation6], 512  }
  0x26   :  { %273 = vsyncadd [#allocation6], 4294966784  ;;  %vm59_vm0 = vcmask 261120   ;;  %v48_v0 = vld [vmem:[#allocation5] sm:$0xff]  ;;  %v49_v1 = vld [vmem:[#allocation5 + $0x8] sm:$0xff]  ;;  %s280_s17 = smov [#allocation7]  }
  0x27   :  { %v50_v2 = vld [vmem:[#allocation5 + $0x10] sm:$0xff]  ;;  %v191_v3 = vpack.c.bf16 %v49_v1, %v48_v0  ;;  %v51_v4 = vld [vmem:[#allocation5 + $0x18] sm:$0xff]  ;;  %s157_s18 = sshll.u32 %s280_s17, 4  ;;  %s158_s18 = int_to_ptr.vmem [resolvable:$true] %s157_s18 }
  0x28   :  { %v46_v5 = vld [vmem:[#allocation2] sm:$0xff]  ;;  %v195_v6 = vpack.c.bf16 %v51_v4, %v50_v2  ;;  %v47_v7 = vld [vmem:[#allocation2 + $0x8] sm:$0xff]  ;;  %s248_s19 = scalar_lea.vmem %s158_s18, 256  ;;  %p253_p3 = scmp.lt.s32.totalorder %s158_s18, %s158_s18 }
  0x29   :  { %188 = vmatprep.mubr.msk.f32.mxu0 %vm59_vm0, %v46_v5  ;;  %192 = vmatprep.subr.bf16.mxu0 %v191_v3  ;;  %v170_v8 = vld [vmem:[%s359_s2] ss:$0 sm:$0xff]  ;;  %p249_p2 = scmp.ne.s32.totalorder %s158_s18, %s248_s19  ;;  %p254_p4 = scmp.lt.s32.totalorder %s248_s19, %s248_s19 }
  0x2a   :  { %194 = vmatpush3.bf16.msra.mxu0 %v191_v3  ;;  %v173_v10 = vld [vmem:[%s360_s3] ss:$0 sm:$0xff] }
  0x2b   :  { %196 = vmatprep.subr.bf16.mxu0 %v195_v6  ;;  %p255_p5 = por %p254_p4, %p253_p3 }
  0x2d   :  { %p256_p6 = pnand %p255_p5, %p249_p2 }
  0x2e   :  { %198 = vmatpush3.bf16.msra.mxu0 %v195_v6 }
  0x31   :  { %189 = vmatmul.mubr.msk.f32.vlgmr.msra.gmra.mrb[0].mxu0 %vm59_vm0, %v47_v7 }
 0x104   :  { %v190_v9 = vpop.f32.mrb[0].mxu0 }
 0x105   :  { %v138_v11 = vadd.f32 %v190_v9, %v170_v8  ;;  %v132_v12 = vpop.f32.mrb[1].mxu0 }
 0x106   :  { %v133_v13 = vadd.f32 %v170_v8, %v132_v12 }
 0x107   :  { %v149_v14 = vmul.f32 %v173_v10, %v138_v11 }
 0x108   :  { %v148_v15 = vmul.f32 %v173_v10, %v133_v13 }
 0x109   :  { %151 = vst [vmem:[#allocation7 + $0x8] sm:$0xff] %v149_v14 }
 0x10a   :  { %150 = vst [vmem:[#allocation7] sm:$0xff] %v148_v15 }
 0x10b   :  { %259 = shalt.err (!%p256_p6)
}
 0x10c   :  { %s260_s3 = scalar_lea.hbm %s361_s4, 256 }
 0x10d   :  { %p261_p7 = scmp.ne.s32.totalorder %s361_s4, %s260_s3  ;;  %p264_p8 = scmp.lt.u32.totalorder %s260_s3, %s361_s4 }
 0x10f   :  { %p266_p9 = pnand %p264_p8, %p261_p7 }
 0x111   :  { %269 = shalt.err (!%p266_p9)
}
 0x112   :  { %163 = dma.vmem_to_hbm [thread:$0]  %s158_s18, 256, %s361_s4, [#allocation4], %s277_s25, %s277_s25, %s278_s26  }
 0x113   :  { %274 = dma.done.wait [#allocation4], 256  }
 0x114   :  { %275 = vsyncadd [#allocation4], 4294967040 }
 0x115   :  { %167 = vsyncpa [#allocation3], 1 }
 0x116   :  { %168 = vsyncpa [#allocation6], 1 }
 0x117   :  { %169 = vsyncpa [#allocation4], 1 }

</bundles_post_ra>
